<compile_context>
chip_gen: v7x
topology: tpu7x:2x2x1
jax: 0.10.0
libtpu: 0.0.40
codegen_flags: <defaults>
</compile_context>

<pallas_src>
import jax
import jax.numpy as jnp
from jax.experimental import pallas as pl
from jax.experimental.pallas import tpu as pltpu

DROPOUT_P = 0.1     # dropout prob passed to PositionwiseFeedForward.__init__
TRAINING = True     # torch dropout is identity in eval mode


def ffn_kernel(x_ref, w1_ref, w2_ref, mask_ref, o_ref):
    # w_1(x): (tile_m, d_model) @ (d_model, d_ff) on the MXU
    h = jnp.dot(x_ref[...], w1_ref[...], preferred_element_type=jnp.float32)
    # relu + dropout: mask is pre-scaled to {0, 1/(1-p)} -> one select + one mul
    h = jnp.maximum(h, 0.0) * mask_ref[...]
    # w_2(.): (tile_m, d_ff) @ (d_ff, d_model)
    o_ref[...] = jnp.dot(h, w2_ref[...],
                         preferred_element_type=jnp.float32).astype(o_ref.dtype)


def positionwise_feed_forward(x, w1, w2, dropout_mask, *, tile_m=256):
    """x: (B, S, d_model) f32; w1: (d_model, d_ff); w2: (d_ff, d_model);
    dropout_mask: (B, S, d_ff) f32 multiplier in {0, 1/(1-p)} (ones for eval)."""
    B, S, D = x.shape
    d_ff = w1.shape[1]
    M = B * S
    x2d = x.reshape(M, D)
    m2d = dropout_mask.reshape(M, d_ff)

    # Large row tiles: amortize per-grid-step overhead and fill MXU rows.
    tm = min(tile_m, M)
    pad = (-M) % tm
    if pad:
        x2d = jnp.pad(x2d, ((0, pad), (0, 0)))
        m2d = jnp.pad(m2d, ((0, pad), (0, 0)))
    Mp = M + pad

    out = pl.pallas_call(
        ffn_kernel,
        out_shape=jax.ShapeDtypeStruct((Mp, D), x.dtype),
        grid=(Mp // tm,),
        in_specs=[
            pl.BlockSpec((tm, D), lambda i: (i, 0)),       # x row tile
            pl.BlockSpec((D, d_ff), lambda i: (0, 0)),     # W1, VMEM-resident
            pl.BlockSpec((d_ff, D), lambda i: (0, 0)),     # W2, VMEM-resident
            pl.BlockSpec((tm, d_ff), lambda i: (i, 0)),    # dropout mask tile
        ],
        out_specs=pl.BlockSpec((tm, D), lambda i: (i, 0)),
        compiler_params=pltpu.CompilerParams(
            # Disjoint output row-tiles, no cross-step accumulator ->
            # shardable across both TensorCores on v7x.
            dimension_semantics=("parallel",),
            vmem_limit_bytes=64 * 1024 * 1024),
    )(x2d, w1, w2, m2d)
    return out[:M].reshape(B, S, D)


if __name__ == "__main__":
    key = jax.random.PRNGKey(0)
    kx, k1, k2, kd = jax.random.split(key, 4)

    B, S, D_MODEL, D_FF = 2, 8, 128, 256
    x = jax.random.normal(kx, (B, S, D_MODEL), dtype=jnp.float32)

    # xavier_normal_(gain=0.002): std = gain * sqrt(2 / (fan_in + fan_out))
    std = 0.002 * (2.0 / (D_MODEL + D_FF)) ** 0.5
    w1 = jax.random.normal(k1, (D_MODEL, D_FF), dtype=jnp.float32) * std
    w2 = jax.random.normal(k2, (D_FF, D_MODEL), dtype=jnp.float32) * std

    if TRAINING and DROPOUT_P > 0.0:
        keep = jax.random.uniform(kd, (B, S, D_FF)) >= DROPOUT_P
        mask = keep.astype(jnp.float32) * (1.0 / (1.0 - DROPOUT_P))
    else:
        mask = jnp.ones((B, S, D_FF), dtype=jnp.float32)

    out = positionwise_feed_forward(x, w1, w2, mask)
    jax.block_until_ready(out)

    # Pure-JAX reference using the same dropout mask.
    h_ref = jnp.maximum(x.reshape(-1, D_MODEL) @ w1, 0.0) * mask.reshape(-1, D_FF)
    ref = (h_ref @ w2).reshape(B, S, D_MODEL)

    assert out.shape == (B, S, D_MODEL) and out.dtype == x.dtype
    assert jnp.allclose(out, ref, atol=1e-3, rtol=1e-3)
    print("KERNEL_OK")
</pallas_src>

<mosaic_0001>
module attributes {stable_mosaic.version = 11 : i64} {
  func.func @ffn_kernel(%arg0: i32, %arg1: memref<16x128xf32, #tpu.memory_space<vmem>>, %arg2: memref<128x256xf32, #tpu.memory_space<vmem>>, %arg3: memref<256x128xf32, #tpu.memory_space<vmem>>, %arg4: memref<16x256xf32, #tpu.memory_space<vmem>>, %arg5: memref<16x128xf32, #tpu.memory_space<vmem>>) attributes {dimension_semantics = [#tpu.dimension_semantics<parallel>], iteration_bounds = array<i64: 1>, scalar_prefetch = 0 : i64, scratch_operands = 0 : i64, tpu.core_type = #tpu.core_type<tc>, window_params = [{transform_indices = @transform_0, window_bounds = array<i64: 16, 128>}, {pipeline_mode = #tpu.pipeline_mode<synchronous>, transform_indices = @transform_1, window_bounds = array<i64: 128, 256>}, {pipeline_mode = #tpu.pipeline_mode<synchronous>, transform_indices = @transform_2, window_bounds = array<i64: 256, 128>}, {transform_indices = @transform_3, window_bounds = array<i64: 16, 256>}, {transform_indices = @transform_4, window_bounds = array<i64: 16, 128>}]} {
    %c0 = arith.constant 0 : index
    %c0_0 = arith.constant 0 : index
    %0 = vector.load %arg1[%c0, %c0_0] : memref<16x128xf32, #tpu.memory_space<vmem>>, vector<16x128xf32>
    %c0_1 = arith.constant 0 : index
    %c0_2 = arith.constant 0 : index
    %1 = vector.load %arg2[%c0_1, %c0_2] : memref<128x256xf32, #tpu.memory_space<vmem>>, vector<128x256xf32>
    %cst = arith.constant dense<0.000000e+00> : vector<16x256xf32>
    %2 = tpu.matmul %0, %1, %cst {dimension_numbers = #tpu.dot_dimension_numbers<[1], [0], [0], [1], [0, 0, 1, 1], [], []>} : vector<16x128xf32>, vector<128x256xf32>, vector<16x256xf32> -> vector<16x256xf32>
    %cst_3 = arith.constant 0.000000e+00 : f32
    %3 = vector.broadcast %cst_3 : f32 to vector<16x256xf32>
    %4 = arith.maximumf %2, %3 : vector<16x256xf32>
    %c0_4 = arith.constant 0 : index
    %c0_5 = arith.constant 0 : index
    %5 = vector.load %arg4[%c0_4, %c0_5] : memref<16x256xf32, #tpu.memory_space<vmem>>, vector<16x256xf32>
    %6 = arith.mulf %4, %5 : vector<16x256xf32>
    %c0_6 = arith.constant 0 : index
    %c0_7 = arith.constant 0 : index
    %7 = vector.load %arg3[%c0_6, %c0_7] : memref<256x128xf32, #tpu.memory_space<vmem>>, vector<256x128xf32>
    %cst_8 = arith.constant dense<0.000000e+00> : vector<16x128xf32>
    %8 = tpu.matmul %6, %7, %cst_8 {dimension_numbers = #tpu.dot_dimension_numbers<[1], [0], [0], [1], [0, 0, 1, 1], [], []>} : vector<16x256xf32>, vector<256x128xf32>, vector<16x128xf32> -> vector<16x128xf32>
    %c0_9 = arith.constant 0 : index
    %c0_10 = arith.constant 0 : index
    %9 = vector.load %arg5[%c0_9, %c0_10] : memref<16x128xf32, #tpu.memory_space<vmem>>, vector<16x128xf32>
    tpu.vector_store %arg5[%c0_9, %c0_10], %8 {strides = array<i32>} : memref<16x128xf32, #tpu.memory_space<vmem>>, vector<16x128xf32>,
    return
  }
  func.func @transform_0(%arg0: i32) -> (i32, i32) {
    %c0_i32 = arith.constant 0 : i32
    %c0_i32_0 = arith.constant 0 : i32
    return %arg0, %c0_i32 : i32, i32
  }
  func.func @transform_1(%arg0: i32) -> (i32, i32) {
    %c0_i32 = arith.constant 0 : i32
    %c0_i32_0 = arith.constant 0 : i32
    %c0_i32_1 = arith.constant 0 : i32
    return %c0_i32, %c0_i32_0 : i32, i32
  }
  func.func @transform_2(%arg0: i32) -> (i32, i32) {
    %c0_i32 = arith.constant 0 : i32
    %c0_i32_0 = arith.constant 0 : i32
    %c0_i32_1 = arith.constant 0 : i32
    return %c0_i32, %c0_i32_0 : i32, i32
  }
  func.func @transform_3(%arg0: i32) -> (i32, i32) {
    %c0_i32 = arith.constant 0 : i32
    %c0_i32_0 = arith.constant 0 : i32
    return %arg0, %c0_i32 : i32, i32
  }
  func.func @transform_4(%arg0: i32) -> (i32, i32) {
    %c0_i32 = arith.constant 0 : i32
    %c0_i32_0 = arith.constant 0 : i32
    return %arg0, %c0_i32 : i32, i32
  }
}

</mosaic_0001>

<bundles_post_ra>
// kernel: tpu_custom_call.1
= control target key start
LH: loop header
LB: loop body
LE: loop exit
PB: predicated region body
PF: predicated region fallthrough
CT: control target
= control target key end

     0   :  { %9 = vsyncpa [#allocation3], 0  ;;  %s673_s0 = inlined_call_operand.hbm [shape: f32[16,128], index: 0, kind: input, shape index: {}]   ;;  %s674_s1 = inlined_call_operand.hbm [shape: f32[128,256], index: 1, kind: input, shape index: {}]   ;;  %s675_s2 = inlined_call_operand.hbm [shape: f32[256,128], index: 2, kind: input, shape index: {}]   ;;  %s676_s3 = inlined_call_operand.hbm [shape: f32[16,256], index: 3, kind: input, shape index: {}]   ;;  %s677_s4 = inlined_call_operand.hbm [shape: f32[16,128], index: 4, kind: output, shape index: {}]  }
   0x1   :  { %10 = vsyncpa [#allocation6], 0 }
   0x2   :  { %11 = vsyncpa [#allocation9], 0 }
   0x3   :  { %12 = vsyncpa [#allocation4], 0  ;;  %s554_s15 = smov [#allocation5]   ;;  %s436_s19 = scalar_lea.hbm %s674_s1, 4096 }
   0x4   :  { %s30_s16 = sshll.u32 %s554_s15, 4  ;;  %p437_p0 = scmp.ne.s32.totalorder %s674_s1, %s436_s19  ;;  %s31_s16 = int_to_ptr.vmem [resolvable:$true] %s30_s16 }
   0x5   :  { %p440_p1 = scmp.lt.u32.totalorder %s436_s19, %s674_s1 }
   0x7   :  { %p442_p2 = pnand %p440_p1, %p437_p0 }
   0x9   :  { %445 = shalt.err (!%p442_p2)
}
   0xa   :  { %s446_s24 = scalar_lea.vmem %s31_s16, 4096  ;;  %p451_p4 = scmp.lt.s32.totalorder %s31_s16, %s31_s16 }
   0xb   :  { %p447_p3 = scmp.ne.s32.totalorder %s31_s16, %s446_s24  ;;  %p452_p5 = scmp.lt.s32.totalorder %s446_s24, %s446_s24 }
   0xd   :  { %p453_p6 = por %p452_p5, %p451_p4 }
   0xf   :  { %p454_p7 = pnand %p453_p6, %p447_p3 }
  0x11   :  { %457 = shalt.err (!%p454_p7)
}
  0x12   :  { %s555_s25 = smov 256   ;;  %s556_s26 = smov 16  }
  0x13   :  { %36 = dma.hbm_to_vmem [thread:$0]  %s674_s1, 4096, %s31_s16, [#allocation6], %s555_s25, %s555_s25, %s556_s26  }
  0x14   :  { %s557_s29 = smov [#allocation2]   ;;  %s458_s7 = scalar_lea.hbm %s673_s0, 256 }
  0x15   :  { %s18_s30 = sshll.u32 %s557_s29, 4  ;;  %p459_p8 = scmp.ne.s32.totalorder %s673_s0, %s458_s7  ;;  %s19_s30 = int_to_ptr.vmem [resolvable:$true] %s18_s30 }
  0x16   :  { %p462_p9 = scmp.lt.u32.totalorder %s458_s7, %s673_s0 }
  0x18   :  { %p464_p10 = pnand %p462_p9, %p459_p8 }
  0x1a   :  { %467 = shalt.err (!%p464_p10)
}
  0x1b   :  { %s468_s12 = scalar_lea.vmem %s19_s30, 256  ;;  %p473_p12 = scmp.lt.s32.totalorder %s19_s30, %s19_s30 }
  0x1c   :  { %p469_p11 = scmp.ne.s32.totalorder %s19_s30, %s468_s12  ;;  %p474_p13 = scmp.lt.s32.totalorder %s468_s12, %s468_s12 }
  0x1e   :  { %p475_p0 = por %p474_p13, %p473_p12 }
  0x20   :  { %p476_p1 = pnand %p475_p0, %p469_p11 }
  0x22   :  { %479 = shalt.err (!%p476_p1)
}
  0x23   :  { %s558_s1 = smov 128   ;;  %s559_s13 = smov 8  }
  0x24   :  { %24 = dma.hbm_to_vmem [thread:$0]  %s673_s0, 256, %s19_s30, [#allocation3], %s558_s1, %s558_s1, %s559_s13  }
  0x25   :  { %s560_s16 = smov [#allocation7]   ;;  %s561_s18 = smov [#allocation8]  }
  0x26   :  { %s42_s17 = sshll.u32 %s560_s16, 4  ;;  %s54_s19 = sshll.u32 %s561_s18, 4  ;;  %s43_s17 = int_to_ptr.vmem [resolvable:$true] %s42_s17  ;;  %s619_s19 = int_to_ptr.vmem [resolvable:$true] %s54_s19 }
  0x27   :  { %s480_s22 = scalar_lea.hbm %s675_s2, 4096 }
  0x28   :  { %p481_p2 = scmp.ne.s32.totalorder %s675_s2, %s480_s22  ;;  %p484_p3 = scmp.lt.u32.totalorder %s480_s22, %s675_s2 }
  0x2a   :  { %p486_p4 = pnand %p484_p3, %p481_p2 }
  0x2c   :  { %489 = shalt.err (!%p486_p4)
}
  0x2d   :  { %s490_s0 = scalar_lea.vmem %s43_s17, 4096  ;;  %p495_p6 = scmp.lt.s32.totalorder %s43_s17, %s43_s17 }
  0x2e   :  { %p491_p5 = scmp.ne.s32.totalorder %s43_s17, %s490_s0  ;;  %p496_p7 = scmp.lt.s32.totalorder %s490_s0, %s490_s0 }
  0x30   :  { %p497_p8 = por %p496_p7, %p495_p6 }
  0x32   :  { %p498_p9 = pnand %p497_p8, %p491_p5 }
  0x34   :  { %501 = shalt.err (!%p498_p9)
}
  0x35   :  { %48 = dma.hbm_to_vmem [thread:$0]  %s675_s2, 4096, %s43_s17, [#allocation6], %s558_s1, %s558_s1, %s559_s13  }
  0x36   :  { %s502_s7 = scalar_lea.hbm %s676_s3, 512 }
  0x37   :  { %p503_p10 = scmp.ne.s32.totalorder %s676_s3, %s502_s7  ;;  %p506_p11 = scmp.lt.u32.totalorder %s502_s7, %s676_s3 }
  0x39   :  { %p508_p12 = pnand %p506_p11, %p503_p10 }
  0x3b   :  { %511 = shalt.err (!%p508_p12)
}
  0x3c   :  { %s512_s12 = scalar_lea.vmem %s619_s19, 512  ;;  %p517_p0 = scmp.lt.s32.totalorder %s619_s19, %s619_s19 }
  0x3d   :  { %p513_p13 = scmp.ne.s32.totalorder %s619_s19, %s512_s12  ;;  %p518_p1 = scmp.lt.s32.totalorder %s512_s12, %s512_s12 }
  0x3f   :  { %p519_p2 = por %p518_p1, %p517_p0 }
  0x41   :  { %p520_p3 = pnand %p519_p2, %p513_p13 }
  0x43   :  { %523 = shalt.err (!%p520_p3)
}
  0x44   :  { %60 = dma.hbm_to_vmem [thread:$0]  %s676_s3, 512, %s619_s19, [#allocation9], %s555_s25, %s555_s25, %s556_s26  }
  0x45   :  { %546 = dma.done.wait [#allocation3], 256  }
  0x46   :  { %547 = vsyncadd [#allocation3], 4294967040 }
  0x47   :  { %548 = dma.done.wait [#allocation6], 8192  }
  0x48   :  { %549 = vsyncadd [#allocation6], 4294959104 }
  0x49   :  { %550 = dma.done.wait [#allocation9], 512  }
  0x4a   :  { %551 = vsyncadd [#allocation9], 4294966784  ;;  %v562_v0 = vmov 0.0   ;;  %v76_v1 = vld [vmem:[#allocation5 + $0x8] sm:$0xff]  ;;  %v78_v2 = vld [vmem:[#allocation5 + $0x18] sm:$0xff]  ;;  %s563_s3 = smov [#allocation10]  }
  0x4b   :  { %171 = vmatprep.mubr.f32.mxu0 %v562_v0  ;;  %v75_v3 = vld [vmem:[#allocation5] sm:$0xff]  ;;  %v362_v4 = vpack.c.bf16 %v78_v2, %v76_v1  ;;  %v77_v5 = vld [vmem:[#allocation5 + $0x10] sm:$0xff]  ;;  %v80_v6 = vld [vmem:[#allocation5 + $0x28] sm:$0xff]  ;;  %s310_s25 = sshll.u32 %s563_s3, 4  ;;  %s311_s25 = int_to_ptr.vmem [resolvable:$true] %s310_s25 }
  0x4c   :  { %v82_v7 = vld [vmem:[#allocation5 + $0x38] sm:$0xff]  ;;  %v364_v8 = vpack.c.bf16 %v77_v5, %v75_v3  ;;  %v79_v10 = vld [vmem:[#allocation5 + $0x20] sm:$0xff]  ;;  %v81_v11 = vld [vmem:[#allocation5 + $0x30] sm:$0xff]  ;;  %s524_s26 = scalar_lea.vmem %s311_s25, 256  ;;  %p529_p5 = scmp.lt.s32.totalorder %s311_s25, %s311_s25 }
  0x4d   :  { %v366_v9 = vpack.c.bf16 %v82_v7, %v80_v6  ;;  %v84_v12 = vld [vmem:[#allocation5 + $0x48] sm:$0xff]  ;;  %363 = vmatprep.subr.bf16.mxu0 %v362_v4  ;;  %v86_v13 = vld [vmem:[#allocation5 + $0x58] sm:$0xff]  ;;  %v368_v14 = vpack.c.bf16 %v81_v11, %v79_v10  ;;  %v83_v16 = vld [vmem:[#allocation5 + $0x40] sm:$0xff]  ;;  %p525_p4 = scmp.ne.s32.totalorder %s311_s25, %s524_s26  ;;  %p530_p6 = scmp.lt.s32.totalorder %s524_s26, %s524_s26 }
  0x4e   :  { %365 = vmatpush1.bf16.msra.mxu0 %v364_v8  ;;  %v370_v15 = vpack.c.bf16 %v86_v13, %v84_v12  ;;  %v85_v17 = vld [vmem:[#allocation5 + $0x50] sm:$0xff]  ;;  %v88_v18 = vld [vmem:[#allocation5 + $0x68] sm:$0xff]  ;;  %v90_v19 = vld [vmem:[#allocation5 + $0x78] sm:$0xff] }
  0x4f   :  { %367 = vmatprep.subr.bf16.mxu0 %v366_v9  ;;  %v372_v20 = vpack.c.bf16 %v85_v17, %v83_v16  ;;  %v374_v21 = vpack.c.bf16 %v90_v19, %v88_v18  ;;  %v87_v22 = vld [vmem:[#allocation5 + $0x60] sm:$0xff]  ;;  %v89_v23 = vld [vmem:[#allocation5 + $0x70] sm:$0xff]  ;;  %v92_v24 = vld [vmem:[#allocation5 + $0x88] sm:$0xff]  ;;  %p531_p7 = por %p530_p6, %p529_p5 }
  0x50   :  { %v94_v25 = vld [vmem:[#allocation5 + $0x98] sm:$0xff]  ;;  %v91_v26 = vld [vmem:[#allocation5 + $0x80] sm:$0xff]  ;;  %v93_v27 = vld [vmem:[#allocation5 + $0x90] sm:$0xff]  ;;  %v376_v30 = vpack.c.bf16 %v89_v23, %v87_v22 }
  0x51   :  { %v212_v28 = vld [vmem:[#allocation7 + $0x80] sm:$0xff]  ;;  %v213_v29 = vld [vmem:[#allocation7 + $0x88] sm:$0xff]  ;;  %v214_v35 = vld [vmem:[#allocation7 + $0x90] sm:$0xff]  ;;  %v378_v36 = vpack.c.bf16 %v94_v25, %v92_v24  ;;  %v380_v46 = vpack.c.bf16 %v93_v27, %v91_v26  ;;  %p532_p8 = pnand %p531_p7, %p525_p4 }
  0x52   :  { %369 = vmatpush1.bf16.msra.mxu0 %v368_v14  ;;  %v96_v31 = vld [vmem:[#allocation5 + $0xa8] sm:$0xff]  ;;  %v394_v32 = vpack.c.bf16 %v213_v29, %v212_v28  ;;  %v196_v33 = vld [vmem:[#allocation7] sm:$0xff]  ;;  %v215_v38 = vld [vmem:[#allocation7 + $0x98] sm:$0xff] }
  0x53   :  { %371 = vmatprep.subr.bf16.mxu0 %v370_v15  ;;  %v197_v34 = vld [vmem:[#allocation7 + $0x8] sm:$0xff]  ;;  %v198_v39 = vld [vmem:[#allocation7 + $0x10] sm:$0xff]  ;;  %v199_v40 = vld [vmem:[#allocation7 + $0x18] sm:$0xff]  ;;  %v398_v42 = vpack.c.bf16 %v215_v38, %v214_v35 }
  0x54   :  { %v396_v37 = vpack.c.bf16 %v197_v34, %v196_v33  ;;  %v98_v41 = vld [vmem:[#allocation5 + $0xb8] sm:$0xff]  ;;  %395 = vmatprep.subr.bf16.mxu1 %v394_v32  ;;  %v216_v43 = vld [vmem:[#allocation7 + $0xa0] sm:$0xff]  ;;  %v217_v44 = vld [vmem:[#allocation7 + $0xa8] sm:$0xff]  ;;  %v400_v45 = vpack.c.bf16 %v199_v40, %v198_v39 }
  0x55   :  { %v95_v47 = vld [vmem:[#allocation5 + $0xa0] sm:$0xff]  ;;  %v402_v48 = vpack.c.bf16 %v217_v44, %v216_v43  ;;  %v201_v50 = vld [vmem:[#allocation7 + $0x28] sm:$0xff]  ;;  %v382_v51 = vpack.c.bf16 %v98_v41, %v96_v31  ;;  %v97_v52 = vld [vmem:[#allocation5 + $0xb0] sm:$0xff] }
  0x56   :  { %373 = vmatpush1.bf16.msra.mxu0 %v372_v20  ;;  %397 = vmatpush3.bf16.msra.mxu1 %v396_v37  ;;  %v200_v49 = vld [vmem:[#allocation7 + $0x20] sm:$0xff]  ;;  %v218_v53 = vld [vmem:[#allocation7 + $0xb0] sm:$0xff]  ;;  %v219_v54 = vld [vmem:[#allocation7 + $0xb8] sm:$0xff]  ;;  %v384_v58 = vpack.c.bf16 %v97_v52, %v95_v47 }
  0x57   :  { %375 = vmatprep.subr.bf16.mxu0 %v374_v21  ;;  %399 = vmatprep.subr.bf16.mxu1 %v398_v42  ;;  %v100_v55 = vld [vmem:[#allocation5 + $0xc8] sm:$0xff]  ;;  %v102_v56 = vld [vmem:[#allocation5 + $0xd8] sm:$0xff]  ;;  %v404_v57 = vpack.c.bf16 %v201_v50, %v200_v49  ;;  %v99_v59 = vld [vmem:[#allocation5 + $0xc0] sm:$0xff]  ;;  %v406_v60 = vpack.c.bf16 %v219_v54, %v218_v53 }
  0x58   :  { %v202_v61 = vld [vmem:[#allocation7 + $0x30] sm:$0xff]  ;;  %v203_v62 = vld [vmem:[#allocation7 + $0x38] sm:$0xff]  ;;  %v386_v63 = vpack.c.bf16 %v102_v56, %v100_v55  ;;  %v220_v2 = vld [vmem:[#allocation7 + $0xc0] sm:$0xff] }
  0x59   :  { %v101_v1 = vld [vmem:[#allocation5 + $0xd0] sm:$0xff]  ;;  %v221_v3 = vld [vmem:[#allocation7 + $0xc8] sm:$0xff]  ;;  %v106_v5 = vld [vmem:[#allocation5 + $0xf8] sm:$0xff]  ;;  %v408_v6 = vpack.c.bf16 %v203_v62, %v202_v61 }
  0x5a   :  { %377 = vmatpush1.bf16.msra.mxu0 %v376_v30  ;;  %401 = vmatpush3.bf16.msra.mxu1 %v400_v45  ;;  %v104_v4 = vld [vmem:[#allocation5 + $0xe8] sm:$0xff]  ;;  %v388_v7 = vpack.c.bf16 %v101_v1, %v99_v59  ;;  %v103_v8 = vld [vmem:[#allocation5 + $0xe0] sm:$0xff]  ;;  %v410_v9 = vpack.c.bf16 %v221_v3, %v220_v2  ;;  %v105_v13 = vld [vmem:[#allocation5 + $0xf0] sm:$0xff] }
  0x5b   :  { %379 = vmatprep.subr.bf16.mxu0 %v378_v36  ;;  %403 = vmatprep.subr.bf16.mxu1 %v402_v48  ;;  %v204_v10 = vld [vmem:[#allocation7 + $0x40] sm:$0xff]  ;;  %v205_v11 = vld [vmem:[#allocation7 + $0x48] sm:$0xff]  ;;  %v390_v12 = vpack.c.bf16 %v106_v5, %v104_v4  ;;  %v222_v14 = vld [vmem:[#allocation7 + $0xd0] sm:$0xff]  ;;  %v392_v17 = vpack.c.bf16 %v105_v13, %v103_v8 }
  0x5c   :  { %v223_v15 = vld [vmem:[#allocation7 + $0xd8] sm:$0xff]  ;;  %v412_v16 = vpack.c.bf16 %v205_v11, %v204_v10  ;;  %v206_v19 = vld [vmem:[#allocation7 + $0x50] sm:$0xff]  ;;  %v224_v21 = vld [vmem:[#allocation7 + $0xe0] sm:$0xff] }
  0x5d   :  { %v414_v18 = vpack.c.bf16 %v223_v15, %v222_v14  ;;  %v207_v20 = vld [vmem:[#allocation7 + $0x58] sm:$0xff]  ;;  %v225_v22 = vld [vmem:[#allocation7 + $0xe8] sm:$0xff]  ;;  %v73_v24 = vld [vmem:[#allocation2] sm:$0xff] }
  0x5e   :  { %381 = vmatpush1.bf16.msra.mxu0 %v380_v46  ;;  %405 = vmatpush3.bf16.msra.mxu1 %v404_v57  ;;  %v416_v23 = vpack.c.bf16 %v207_v20, %v206_v19  ;;  %v418_v25 = vpack.c.bf16 %v225_v22, %v224_v21  ;;  %v74_v26 = vld [vmem:[#allocation2 + $0x8] sm:$0xff]  ;;  %v208_v27 = vld [vmem:[#allocation7 + $0x60] sm:$0xff]  ;;  %v209_v28 = vld [vmem:[#allocation7 + $0x68] sm:$0xff] }
  0x5f   :  { %383 = vmatprep.subr.bf16.mxu0 %v382_v51  ;;  %407 = vmatprep.subr.bf16.mxu1 %v406_v60  ;;  %v420_v29 = vpack.c.bf16 %v209_v28, %v208_v27  ;;  %v226_v30 = vld [vmem:[#allocation7 + $0xf0] sm:$0xff]  ;;  %v227_v31 = vld [vmem:[#allocation7 + $0xf8] sm:$0xff]  ;;  %v189_v39 = vld [vmem:[#allocation8 + $0x8] sm:$0xff] }
  0x60   :  { %v422_v32 = vpack.c.bf16 %v227_v31, %v226_v30  ;;  %v210_v33 = vld [vmem:[#allocation7 + $0x70] sm:$0xff]  ;;  %v211_v34 = vld [vmem:[#allocation7 + $0x78] sm:$0xff] }
  0x61   :  { %v424_v35 = vpack.c.bf16 %v211_v34, %v210_v33  ;;  %v191_v46 = vld [vmem:[#allocation8 + $0x18] sm:$0xff]  ;;  %v190_v47 = vld [vmem:[#allocation8 + $0x10] sm:$0xff] }
  0x62   :  { %385 = vmatpush1.bf16.msra.mxu0 %v384_v58  ;;  %409 = vmatpush3.bf16.msra.mxu1 %v408_v6 }
  0x63   :  { %387 = vmatprep.subr.bf16.mxu0 %v386_v63  ;;  %411 = vmatprep.subr.bf16.mxu1 %v410_v9 }
  0x66   :  { %389 = vmatpush1.bf16.msra.mxu0 %v388_v7  ;;  %413 = vmatpush3.bf16.msra.mxu1 %v412_v16 }
  0x67   :  { %391 = vmatprep.subr.bf16.mxu0 %v390_v12  ;;  %415 = vmatprep.subr.bf16.mxu1 %v414_v18 }
  0x6a   :  { %393 = vmatpush1.bf16.msra.mxu0 %v392_v17  ;;  %417 = vmatpush3.bf16.msra.mxu1 %v416_v23 }
  0x6b   :  { %419 = vmatprep.subr.bf16.mxu1 %v418_v25 }
  0x6d   :  { %172 = vmatmul.mubr.f32.vlgmr.msra.gmra.mrb[0].mxu0 %v73_v24 }
  0x6e   :  { %177 = vmatprep.mubr.f32.mxu0 %v562_v0  ;;  %421 = vmatpush3.bf16.msra.mxu1 %v420_v29  ;;  %v188_v0 = vld [vmem:[#allocation8] sm:$0xff] }
  0x6f   :  { %423 = vmatprep.subr.bf16.mxu1 %v422_v32 }
  0x71   :  { %178 = vmatmul.mubr.f32.gmra.mrb[2].mxu0 %v74_v26 }
  0x72   :  { %425 = vmatpush3.bf16.msra.mxu1 %v424_v35 }
 0x140   :  { %v173_v36 = vpop.f32.mrb[0].mxu0 }
 0x141   :  { %v184_v37 = vmax.f32 %v173_v36, 0.0  ;;  %v175_v38 = vpop.f32.mrb[1].mxu0 }
 0x142   :  { %v185_v40 = vmax.f32 %v175_v38, 0.0 }
 0x143   :  { %v192_v43 = vmul.f32 %v188_v0, %v184_v37 }
 0x144   :  { %v179_v41 = vpop.f32.mrb[2].mxu0  ;;  %v193_v42 = vmul.f32 %v189_v39, %v185_v40 }
 0x145   :  { %v186_v44 = vmax.f32 %v179_v41, 0.0  ;;  %v181_v45 = vpop.f32.mrb[3].mxu0 }
 0x146   :  { %v187_v48 = vmax.f32 %v181_v45, 0.0  ;;  %292 = vmatprep.mubr.f32.mxu1 %v193_v42 }
 0x147   :  { %293 = vmatmul.mubr.f32.vlgmr.msra.gmra.mrb[0].mxu1 %v192_v43  ;;  %v194_v50 = vmul.f32 %v190_v47, %v186_v44 }
 0x148   :  { %v195_v49 = vmul.f32 %v191_v46, %v187_v48 }
 0x14a   :  { %297 = vmatprep.mubr.f32.mxu1 %v195_v49 }
 0x14b   :  { %298 = vmatmul.mubr.f32.gmra.mrb[2].mxu1 %v194_v50 }
 0x21a   :  { %v356_v51 = vpop.f32.mrb[0].mxu1 }
 0x21b   :  { %v357_v52 = vpop.f32.mrb[1].mxu1 }
 0x21c   :  { %v358_v53 = vadd.f32 %v357_v52, %v356_v51 }
 0x21e   :  { %303 = vst [vmem:[#allocation10] sm:$0xff] %v358_v53  ;;  %v359_v54 = vpop.f32.mrb[2].mxu1 }
 0x21f   :  { %v360_v55 = vpop.f32.mrb[3].mxu1 }
 0x220   :  { %v361_v56 = vadd.f32 %v360_v55, %v359_v54 }
 0x222   :  { %304 = vst [vmem:[#allocation10 + $0x8] sm:$0xff] %v361_v56 }
 0x223   :  { %535 = shalt.err (!%p532_p8)
}
 0x224   :  { %s536_s17 = scalar_lea.hbm %s677_s4, 256 }
 0x225   :  { %p537_p9 = scmp.ne.s32.totalorder %s677_s4, %s536_s17  ;;  %p540_p10 = scmp.lt.u32.totalorder %s536_s17, %s677_s4 }
 0x227   :  { %p542_p11 = pnand %p540_p10, %p537_p9 }
 0x229   :  { %545 = shalt.err (!%p542_p11)
}
 0x22a   :  { %316 = dma.vmem_to_hbm [thread:$0]  %s311_s25, 256, %s677_s4, [#allocation4], %s558_s1, %s558_s1, %s559_s13  }
 0x22b   :  { %552 = dma.done.wait [#allocation4], 256  }
 0x22c   :  { %553 = vsyncadd [#allocation4], 4294967040 }
 0x22d   :  { %320 = vsyncpa [#allocation3], 1 }
 0x22e   :  { %321 = vsyncpa [#allocation6], 1 }
 0x22f   :  { %322 = vsyncpa [#allocation9], 1 }
 0x230   :  { %323 = vsyncpa [#allocation4], 1 }

</bundles_post_ra>
